<compile_context>
chip_gen: v7x
topology: tpu7x:2x2x1
jax: 0.10.0
libtpu: 0.0.40
codegen_flags: <defaults>
</compile_context>

<pallas_src>
import jax
import jax.numpy as jnp
from jax.experimental import pallas as pl
from jax.experimental.pallas import tpu as pltpu

REPEATS = 50  # torch.cat([v1] * 50, dim=1)


def _mm_cat_kernel(x1_ref, x2_ref, o_ref):
    # One MXU matmul per grid step; result stays in vregs in the output dtype.
    acc = jnp.dot(x1_ref[...], x2_ref[...], preferred_element_type=jnp.float32)
    acc = acc.astype(o_ref.dtype)
    # The 50-way concat: unrolled lane-dense stores of the resident tile into
    # the (tm, REPEATS, tn) output block.  No jnp.tile, no XLU permutes —
    # pure store/DMA writeback work.
    for j in range(o_ref.shape[1]):
        o_ref[:, j, :] = acc


def mm_cat(x1, x2, repeats=REPEATS, tm=128, tn=512):
    M, K = x1.shape
    K2, N = x2.shape
    assert K == K2, "inner dims must match for mm"

    # Row/col tiles; fall back to the full extent when the dim is not an exact
    # multiple (covers the module's toy shapes).  The repeat axis is never
    # gridded — all `repeats` copies are written inside one grid step.
    if M % tm != 0:
        tm = M
    if N % tn != 0:
        tn = N

    # Keep the double-buffered output block inside the default scoped-VMEM
    # budget on every generation (shrink tn first, then tm).
    itemsize = jnp.dtype(x1.dtype).itemsize
    budget = 8 * 1024 * 1024  # bytes for ONE output buffer (2x for dbl-buffer)

    def out_block_bytes(tm_, tn_):
        return tm_ * repeats * tn_ * itemsize

    while tn > 128 and N % (tn // 2) == 0 and 2 * out_block_bytes(tm, tn) > budget:
        tn //= 2
    while tm > 8 and M % (tm // 2) == 0 and 2 * out_block_bytes(tm, tn) > budget:
        tm //= 2

    grid = (M // tm, N // tn)

    cost = pl.CostEstimate(
        flops=2 * M * K * N,
        transcendentals=0,
        bytes_accessed=(M * K + K * N + M * repeats * N) * itemsize,
    )

    out3 = pl.pallas_call(
        _mm_cat_kernel,
        out_shape=jax.ShapeDtypeStruct((M, repeats, N), x1.dtype),
        grid=grid,
        in_specs=[
            pl.BlockSpec((tm, K), lambda i, j: (i, 0)),
            pl.BlockSpec((K, tn), lambda i, j: (0, j)),
        ],
        out_specs=pl.BlockSpec((tm, repeats, tn), lambda i, j: (i, 0, j)),
        compiler_params=pltpu.CompilerParams(
            dimension_semantics=("parallel", "parallel"),
        ),
        cost_estimate=cost,
    )(x1, x2)
    # (M, REPEATS, N) -> (M, REPEATS*N) is a free row-major reshape and exactly
    # matches torch.cat([v1] * REPEATS, dim=1).
    return out3.reshape(M, repeats * N)


def reference(x1, x2):
    v1 = jnp.dot(x1, x2, precision=jax.lax.Precision.HIGHEST)
    return jnp.concatenate([v1] * REPEATS, axis=1)


if __name__ == "__main__":
    key = jax.random.PRNGKey(0)
    k1, k2, k3, k4 = jax.random.split(key, 4)

    # --- Test 1: module-implied toy shapes (1,5) @ (5,4) -> (1, 200) ---
    x1 = jax.random.normal(k1, (1, 5), dtype=jnp.float32)
    x2 = jax.random.normal(k2, (5, 4), dtype=jnp.float32)
    out = jax.block_until_ready(mm_cat(x1, x2))
    ref = reference(x1, x2)
    assert out.shape == (1, REPEATS * 4), out.shape
    assert jnp.allclose(out, ref, atol=1e-3, rtol=1e-3), "toy-shape mismatch"

    # --- Test 2: one (8,128) MXU/lane tile -> exercises lane-dense stores ---
    M, K, N = 8, 128, 128
    a = jax.random.normal(k3, (M, K), dtype=jnp.float32)
    b = jax.random.normal(k4, (K, N), dtype=jnp.float32)
    out2 = jax.block_until_ready(mm_cat(a, b))
    assert out2.shape == (M, REPEATS * N), out2.shape
    # Structural check: all 50 concatenated copies are bit-identical.
    out2_3d = out2.reshape(M, REPEATS, N)
    assert bool(jnp.all(out2_3d == out2_3d[:, :1, :])), "repeat slices differ"
    # Numerical check vs high-precision XLA dot (MXU f32 multi-pass path).
    ref2 = jnp.dot(a, b, precision=jax.lax.Precision.HIGHEST)
    assert jnp.allclose(out2_3d[:, 0, :], ref2, atol=2e-2, rtol=2e-2), \
        "matmul mismatch vs reference"

    print("KERNEL_OK")
</pallas_src>

<mosaic_0001>
module attributes {stable_mosaic.version = 11 : i64} {
  func.func @_mm_cat_kernel(%arg0: i32, %arg1: i32, %arg2: memref<1x5xf32, #tpu.memory_space<vmem>>, %arg3: memref<5x4xf32, #tpu.memory_space<vmem>>, %arg4: memref<1x50x4xf32, #tpu.memory_space<vmem>>) attributes {dimension_semantics = [#tpu.dimension_semantics<parallel>, #tpu.dimension_semantics<parallel>], iteration_bounds = array<i64: 1, 1>, scalar_prefetch = 0 : i64, scratch_operands = 0 : i64, tpu.core_type = #tpu.core_type<tc>, window_params = [{transform_indices = @transform_0, window_bounds = array<i64: 1, 5>}, {transform_indices = @transform_1, window_bounds = array<i64: 5, 4>}, {transform_indices = @transform_2, window_bounds = array<i64: 1, 50, 4>}]} {
    %c0 = arith.constant 0 : index
    %c0_0 = arith.constant 0 : index
    %0 = vector.load %arg2[%c0, %c0_0] : memref<1x5xf32, #tpu.memory_space<vmem>>, vector<1x5xf32>
    %c0_1 = arith.constant 0 : index
    %c0_2 = arith.constant 0 : index
    %1 = vector.load %arg3[%c0_1, %c0_2] : memref<5x4xf32, #tpu.memory_space<vmem>>, vector<5x4xf32>
    %cst = arith.constant dense<0.000000e+00> : vector<1x4xf32>
    %2 = tpu.matmul %0, %1, %cst {dimension_numbers = #tpu.dot_dimension_numbers<[1], [0], [0], [1], [0, 0, 1, 1], [], []>} : vector<1x5xf32>, vector<5x4xf32>, vector<1x4xf32> -> vector<1x4xf32>
    %c0_3 = arith.constant 0 : index
    %c0_4 = arith.constant 0 : index
    %c0_5 = arith.constant 0 : index
    %3 = vector.load %arg4[%c0_3, %c0_4, %c0_5] : memref<1x50x4xf32, #tpu.memory_space<vmem>>, vector<1x1x4xf32>
    %4 = vector.shape_cast %3 : vector<1x1x4xf32> to vector<1x4xf32>
    %5 = vector.shape_cast %2 : vector<1x4xf32> to vector<1x1x4xf32>
    tpu.vector_store %arg4[%c0_3, %c0_4, %c0_5], %5 {strides = array<i32>} : memref<1x50x4xf32, #tpu.memory_space<vmem>>, vector<1x1x4xf32>,
    %c0_6 = arith.constant 0 : index
    %c1 = arith.constant 1 : index
    %c0_7 = arith.constant 0 : index
    %6 = vector.load %arg4[%c0_6, %c1, %c0_7] : memref<1x50x4xf32, #tpu.memory_space<vmem>>, vector<1x1x4xf32>
    %7 = vector.shape_cast %6 : vector<1x1x4xf32> to vector<1x4xf32>
    %8 = vector.shape_cast %2 : vector<1x4xf32> to vector<1x1x4xf32>
    tpu.vector_store %arg4[%c0_6, %c1, %c0_7], %8 {strides = array<i32>} : memref<1x50x4xf32, #tpu.memory_space<vmem>>, vector<1x1x4xf32>,
    %c0_8 = arith.constant 0 : index
    %c2 = arith.constant 2 : index
    %c0_9 = arith.constant 0 : index
    %9 = vector.load %arg4[%c0_8, %c2, %c0_9] : memref<1x50x4xf32, #tpu.memory_space<vmem>>, vector<1x1x4xf32>
    %10 = vector.shape_cast %9 : vector<1x1x4xf32> to vector<1x4xf32>
    %11 = vector.shape_cast %2 : vector<1x4xf32> to vector<1x1x4xf32>
    tpu.vector_store %arg4[%c0_8, %c2, %c0_9], %11 {strides = array<i32>} : memref<1x50x4xf32, #tpu.memory_space<vmem>>, vector<1x1x4xf32>,
    %c0_10 = arith.constant 0 : index
    %c3 = arith.constant 3 : index
    %c0_11 = arith.constant 0 : index
    %12 = vector.load %arg4[%c0_10, %c3, %c0_11] : memref<1x50x4xf32, #tpu.memory_space<vmem>>, vector<1x1x4xf32>
    %13 = vector.shape_cast %12 : vector<1x1x4xf32> to vector<1x4xf32>
    %14 = vector.shape_cast %2 : vector<1x4xf32> to vector<1x1x4xf32>
    tpu.vector_store %arg4[%c0_10, %c3, %c0_11], %14 {strides = array<i32>} : memref<1x50x4xf32, #tpu.memory_space<vmem>>, vector<1x1x4xf32>,
    %c0_12 = arith.constant 0 : index
    %c4 = arith.constant 4 : index
    %c0_13 = arith.constant 0 : index
    %15 = vector.load %arg4[%c0_12, %c4, %c0_13] : memref<1x50x4xf32, #tpu.memory_space<vmem>>, vector<1x1x4xf32>
    %16 = vector.shape_cast %15 : vector<1x1x4xf32> to vector<1x4xf32>
    %17 = vector.shape_cast %2 : vector<1x4xf32> to vector<1x1x4xf32>
    tpu.vector_store %arg4[%c0_12, %c4, %c0_13], %17 {strides = array<i32>} : memref<1x50x4xf32, #tpu.memory_space<vmem>>, vector<1x1x4xf32>,
    %c0_14 = arith.constant 0 : index
    %c5 = arith.constant 5 : index
    %c0_15 = arith.constant 0 : index
    %18 = vector.load %arg4[%c0_14, %c5, %c0_15] : memref<1x50x4xf32, #tpu.memory_space<vmem>>, vector<1x1x4xf32>
    %19 = vector.shape_cast %18 : vector<1x1x4xf32> to vector<1x4xf32>
    %20 = vector.shape_cast %2 : vector<1x4xf32> to vector<1x1x4xf32>
    tpu.vector_store %arg4[%c0_14, %c5, %c0_15], %20 {strides = array<i32>} : memref<1x50x4xf32, #tpu.memory_space<vmem>>, vector<1x1x4xf32>,
    %c0_16 = arith.constant 0 : index
    %c6 = arith.constant 6 : index
    %c0_17 = arith.constant 0 : index
    %21 = vector.load %arg4[%c0_16, %c6, %c0_17] : memref<1x50x4xf32, #tpu.memory_space<vmem>>, vector<1x1x4xf32>
    %22 = vector.shape_cast %21 : vector<1x1x4xf32> to vector<1x4xf32>
    %23 = vector.shape_cast %2 : vector<1x4xf32> to vector<1x1x4xf32>
    tpu.vector_store %arg4[%c0_16, %c6, %c0_17], %23 {strides = array<i32>} : memref<1x50x4xf32, #tpu.memory_space<vmem>>, vector<1x1x4xf32>,
    %c0_18 = arith.constant 0 : index
    %c7 = arith.constant 7 : index
    %c0_19 = arith.constant 0 : index
    %24 = vector.load %arg4[%c0_18, %c7, %c0_19] : memref<1x50x4xf32, #tpu.memory_space<vmem>>, vector<1x1x4xf32>
    %25 = vector.shape_cast %24 : vector<1x1x4xf32> to vector<1x4xf32>
    %26 = vector.shape_cast %2 : vector<1x4xf32> to vector<1x1x4xf32>
    tpu.vector_store %arg4[%c0_18, %c7, %c0_19], %26 {strides = array<i32>} : memref<1x50x4xf32, #tpu.memory_space<vmem>>, vector<1x1x4xf32>,
    %c0_20 = arith.constant 0 : index
    %c8 = arith.constant 8 : index
    %c0_21 = arith.constant 0 : index
    %27 = vector.load %arg4[%c0_20, %c8, %c0_21] : memref<1x50x4xf32, #tpu.memory_space<vmem>>, vector<1x1x4xf32>
    %28 = vector.shape_cast %27 : vector<1x1x4xf32> to vector<1x4xf32>
    %29 = vector.shape_cast %2 : vector<1x4xf32> to vector<1x1x4xf32>
    tpu.vector_store %arg4[%c0_20, %c8, %c0_21], %29 {strides = array<i32>} : memref<1x50x4xf32, #tpu.memory_space<vmem>>, vector<1x1x4xf32>,
    %c0_22 = arith.constant 0 : index
    %c9 = arith.constant 9 : index
    %c0_23 = arith.constant 0 : index
    %30 = vector.load %arg4[%c0_22, %c9, %c0_23] : memref<1x50x4xf32, #tpu.memory_space<vmem>>, vector<1x1x4xf32>
    %31 = vector.shape_cast %30 : vector<1x1x4xf32> to vector<1x4xf32>
    %32 = vector.shape_cast %2 : vector<1x4xf32> to vector<1x1x4xf32>
    tpu.vector_store %arg4[%c0_22, %c9, %c0_23], %32 {strides = array<i32>} : memref<1x50x4xf32, #tpu.memory_space<vmem>>, vector<1x1x4xf32>,
    %c0_24 = arith.constant 0 : index
    %c10 = arith.constant 10 : index
    %c0_25 = arith.constant 0 : index
    %33 = vector.load %arg4[%c0_24, %c10, %c0_25] : memref<1x50x4xf32, #tpu.memory_space<vmem>>, vector<1x1x4xf32>
    %34 = vector.shape_cast %33 : vector<1x1x4xf32> to vector<1x4xf32>
    %35 = vector.shape_cast %2 : vector<1x4xf32> to vector<1x1x4xf32>
    tpu.vector_store %arg4[%c0_24, %c10, %c0_25], %35 {strides = array<i32>} : memref<1x50x4xf32, #tpu.memory_space<vmem>>, vector<1x1x4xf32>,
    %c0_26 = arith.constant 0 : index
    %c11 = arith.constant 11 : index
    %c0_27 = arith.constant 0 : index
    %36 = vector.load %arg4[%c0_26, %c11, %c0_27] : memref<1x50x4xf32, #tpu.memory_space<vmem>>, vector<1x1x4xf32>
    %37 = vector.shape_cast %36 : vector<1x1x4xf32> to vector<1x4xf32>
    %38 = vector.shape_cast %2 : vector<1x4xf32> to vector<1x1x4xf32>
    tpu.vector_store %arg4[%c0_26, %c11, %c0_27], %38 {strides = array<i32>} : memref<1x50x4xf32, #tpu.memory_space<vmem>>, vector<1x1x4xf32>,
    %c0_28 = arith.constant 0 : index
    %c12 = arith.constant 12 : index
    %c0_29 = arith.constant 0 : index
    %39 = vector.load %arg4[%c0_28, %c12, %c0_29] : memref<1x50x4xf32, #tpu.memory_space<vmem>>, vector<1x1x4xf32>
    %40 = vector.shape_cast %39 : vector<1x1x4xf32> to vector<1x4xf32>
    %41 = vector.shape_cast %2 : vector<1x4xf32> to vector<1x1x4xf32>
    tpu.vector_store %arg4[%c0_28, %c12, %c0_29], %41 {strides = array<i32>} : memref<1x50x4xf32, #tpu.memory_space<vmem>>, vector<1x1x4xf32>,
    %c0_30 = arith.constant 0 : index
    %c13 = arith.constant 13 : index
    %c0_31 = arith.constant 0 : index
    %42 = vector.load %arg4[%c0_30, %c13, %c0_31] : memref<1x50x4xf32, #tpu.memory_space<vmem>>, vector<1x1x4xf32>
    %43 = vector.shape_cast %42 : vector<1x1x4xf32> to vector<1x4xf32>
    %44 = vector.shape_cast %2 : vector<1x4xf32> to vector<1x1x4xf32>
    tpu.vector_store %arg4[%c0_30, %c13, %c0_31], %44 {strides = array<i32>} : memref<1x50x4xf32, #tpu.memory_space<vmem>>, vector<1x1x4xf32>,
    %c0_32 = arith.constant 0 : index
    %c14 = arith.constant 14 : index
    %c0_33 = arith.constant 0 : index
    %45 = vector.load %arg4[%c0_32, %c14, %c0_33] : memref<1x50x4xf32, #tpu.memory_space<vmem>>, vector<1x1x4xf32>
    %46 = vector.shape_cast %45 : vector<1x1x4xf32> to vector<1x4xf32>
    %47 = vector.shape_cast %2 : vector<1x4xf32> to vector<1x1x4xf32>
    tpu.vector_store %arg4[%c0_32, %c14, %c0_33], %47 {strides = array<i32>} : memref<1x50x4xf32, #tpu.memory_space<vmem>>, vector<1x1x4xf32>,
    %c0_34 = arith.constant 0 : index
    %c15 = arith.constant 15 : index
    %c0_35 = arith.constant 0 : index
    %48 = vector.load %arg4[%c0_34, %c15, %c0_35] : memref<1x50x4xf32, #tpu.memory_space<vmem>>, vector<1x1x4xf32>
    %49 = vector.shape_cast %48 : vector<1x1x4xf32> to vector<1x4xf32>
    %50 = vector.shape_cast %2 : vector<1x4xf32> to vector<1x1x4xf32>
    tpu.vector_store %arg4[%c0_34, %c15, %c0_35], %50 {strides = array<i32>} : memref<1x50x4xf32, #tpu.memory_space<vmem>>, vector<1x1x4xf32>,
    %c0_36 = arith.constant 0 : index
    %c16 = arith.constant 16 : index
    %c0_37 = arith.constant 0 : index
    %51 = vector.load %arg4[%c0_36, %c16, %c0_37] : memref<1x50x4xf32, #tpu.memory_space<vmem>>, vector<1x1x4xf32>
    %52 = vector.shape_cast %51 : vector<1x1x4xf32> to vector<1x4xf32>
    %53 = vector.shape_cast %2 : vector<1x4xf32> to vector<1x1x4xf32>
    tpu.vector_store %arg4[%c0_36, %c16, %c0_37], %53 {strides = array<i32>} : memref<1x50x4xf32, #tpu.memory_space<vmem>>, vector<1x1x4xf32>,
    %c0_38 = arith.constant 0 : index
    %c17 = arith.constant 17 : index
    %c0_39 = arith.constant 0 : index
    %54 = vector.load %arg4[%c0_38, %c17, %c0_39] : memref<1x50x4xf32, #tpu.memory_space<vmem>>, vector<1x1x4xf32>
    %55 = vector.shape_cast %54 : vector<1x1x4xf32> to vector<1x4xf32>
    %56 = vector.shape_cast %2 : vector<1x4xf32> to vector<1x1x4xf32>
    tpu.vector_store %arg4[%c0_38, %c17, %c0_39], %56 {strides = array<i32>} : memref<1x50x4xf32, #tpu.memory_space<vmem>>, vector<1x1x4xf32>,
    %c0_40 = arith.constant 0 : index
    %c18 = arith.constant 18 : index
    %c0_41 = arith.constant 0 : index
    %57 = vector.load %arg4[%c0_40, %c18, %c0_41] : memref<1x50x4xf32, #tpu.memory_space<vmem>>, vector<1x1x4xf32>
    %58 = vector.shape_cast %57 : vector<1x1x4xf32> to vector<1x4xf32>
    %59 = vector.shape_cast %2 : vector<1x4xf32> to vector<1x1x4xf32>
    tpu.vector_store %arg4[%c0_40, %c18, %c0_41], %59 {strides = array<i32>} : memref<1x50x4xf32, #tpu.memory_space<vmem>>, vector<1x1x4xf32>,
    %c0_42 = arith.constant 0 : index
    %c19 = arith.constant 19 : index
    %c0_43 = arith.constant 0 : index
    %60 = vector.load %arg4[%c0_42, %c19, %c0_43] : memref<1x50x4xf32, #tpu.memory_space<vmem>>, vector<1x1x4xf32>
    %61 = vector.shape_cast %60 : vector<1x1x4xf32> to vector<1x4xf32>
    %62 = vector.shape_cast %2 : vector<1x4xf32> to vector<1x1x4xf32>
    tpu.vector_store %arg4[%c0_42, %c19, %c0_43], %62 {strides = array<i32>} : memref<1x50x4xf32, #tpu.memory_space<vmem>>, vector<1x1x4xf32>,
    %c0_44 = arith.constant 0 : index
    %c20 = arith.constant 20 : index
    %c0_45 = arith.constant 0 : index
    %63 = vector.load %arg4[%c0_44, %c20, %c0_45] : memref<1x50x4xf32, #tpu.memory_space<vmem>>, vector<1x1x4xf32>
    %64 = vector.shape_cast %63 : vector<1x1x4xf32> to vector<1x4xf32>
    %65 = vector.shape_cast %2 : vector<1x4xf32> to vector<1x1x4xf32>
    tpu.vector_store %arg4[%c0_44, %c20, %c0_45], %65 {strides = array<i32>} : memref<1x50x4xf32, #tpu.memory_space<vmem>>, vector<1x1x4xf32>,
    %c0_46 = arith.constant 0 : index
    %c21 = arith.constant 21 : index
    %c0_47 = arith.constant 0 : index
    %66 = vector.load %arg4[%c0_46, %c21, %c0_47] : memref<1x50x4xf32, #tpu.memory_space<vmem>>, vector<1x1x4xf32>
    %67 = vector.shape_cast %66 : vector<1x1x4xf32> to vector<1x4xf32>
    %68 = vector.shape_cast %2 : vector<1x4xf32> to vector<1x1x4xf32>
    tpu.vector_store %arg4[%c0_46, %c21, %c0_47], %68 {strides = array<i32>} : memref<1x50x4xf32, #tpu.memory_space<vmem>>, vector<1x1x4xf32>,
    %c0_48 = arith.constant 0 : index
    %c22 = arith.constant 22 : index
    %c0_49 = arith.constant 0 : index
    %69 = vector.load %arg4[%c0_48, %c22, %c0_49] : memref<1x50x4xf32, #tpu.memory_space<vmem>>, vector<1x1x4xf32>
    %70 = vector.shape_cast %69 : vector<1x1x4xf32> to vector<1x4xf32>
    %71 = vector.shape_cast %2 : vector<1x4xf32> to vector<1x1x4xf32>
    tpu.vector_store %arg4[%c0_48, %c22, %c0_49], %71 {strides = array<i32>} : memref<1x50x4xf32, #tpu.memory_space<vmem>>, vector<1x1x4xf32>,
    %c0_50 = arith.constant 0 : index
    %c23 = arith.constant 23 : index
    %c0_51 = arith.constant 0 : index
    %72 = vector.load %arg4[%c0_50, %c23, %c0_51] : memref<1x50x4xf32, #tpu.memory_space<vmem>>, vector<1x1x4xf32>
    %73 = vector.shape_cast %72 : vector<1x1x4xf32> to vector<1x4xf32>
    %74 = vector.shape_cast %2 : vector<1x4xf32> to vector<1x1x4xf32>
    tpu.vector_store %arg4[%c0_50, %c23, %c0_51], %74 {strides = array<i32>} : memref<1x50x4xf32, #tpu.memory_space<vmem>>, vector<1x1x4xf32>,
    %c0_52 = arith.constant 0 : index
    %c24 = arith.constant 24 : index
    %c0_53 = arith.constant 0 : index
    %75 = vector.load %arg4[%c0_52, %c24, %c0_53] : memref<1x50x4xf32, #tpu.memory_space<vmem>>, vector<1x1x4xf32>
    %76 = vector.shape_cast %75 : vector<1x1x4xf32> to vector<1x4xf32>
    %77 = vector.shape_cast %2 : vector<1x4xf32> to vector<1x1x4xf32>
    tpu.vector_store %arg4[%c0_52, %c24, %c0_53], %77 {strides = array<i32>} : memref<1x50x4xf32, #tpu.memory_space<vmem>>, vector<1x1x4xf32>,
    %c0_54 = arith.constant 0 : index
    %c25 = arith.constant 25 : index
    %c0_55 = arith.constant 0 : index
    %78 = vector.load %arg4[%c0_54, %c25, %c0_55] : memref<1x50x4xf32, #tpu.memory_space<vmem>>, vector<1x1x4xf32>
    %79 = vector.shape_cast %78 : vector<1x1x4xf32> to vector<1x4xf32>
    %80 = vector.shape_cast %2 : vector<1x4xf32> to vector<1x1x4xf32>
    tpu.vector_store %arg4[%c0_54, %c25, %c0_55], %80 {strides = array<i32>} : memref<1x50x4xf32, #tpu.memory_space<vmem>>, vector<1x1x4xf32>,
    %c0_56 = arith.constant 0 : index
    %c26 = arith.constant 26 : index
    %c0_57 = arith.constant 0 : index
    %81 = vector.load %arg4[%c0_56, %c26, %c0_57] : memref<1x50x4xf32, #tpu.memory_space<vmem>>, vector<1x1x4xf32>
    %82 = vector.shape_cast %81 : vector<1x1x4xf32> to vector<1x4xf32>
    %83 = vector.shape_cast %2 : vector<1x4xf32> to vector<1x1x4xf32>
    tpu.vector_store %arg4[%c0_56, %c26, %c0_57], %83 {strides = array<i32>} : memref<1x50x4xf32, #tpu.memory_space<vmem>>, vector<1x1x4xf32>,
    %c0_58 = arith.constant 0 : index
    %c27 = arith.constant 27 : index
    %c0_59 = arith.constant 0 : index
    %84 = vector.load %arg4[%c0_58, %c27, %c0_59] : memref<1x50x4xf32, #tpu.memory_space<vmem>>, vector<1x1x4xf32>
    %85 = vector.shape_cast %84 : vector<1x1x4xf32> to vector<1x4xf32>
    %86 = vector.shape_cast %2 : vector<1x4xf32> to vector<1x1x4xf32>
    tpu.vector_store %arg4[%c0_58, %c27, %c0_59], %86 {strides = array<i32>} : memref<1x50x4xf32, #tpu.memory_space<vmem>>, vector<1x1x4xf32>,
    %c0_60 = arith.constant 0 : index
    %c28 = arith.constant 28 : index
    %c0_61 = arith.constant 0 : index
    %87 = vector.load %arg4[%c0_60, %c28, %c0_61] : memref<1x50x4xf32, #tpu.memory_space<vmem>>, vector<1x1x4xf32>
    %88 = vector.shape_cast %87 : vector<1x1x4xf32> to vector<1x4xf32>
    %89 = vector.shape_cast %2 : vector<1x4xf32> to vector<1x1x4xf32>
    tpu.vector_store %arg4[%c0_60, %c28, %c0_61], %89 {strides = array<i32>} : memref<1x50x4xf32, #tpu.memory_space<vmem>>, vector<1x1x4xf32>,
    %c0_62 = arith.constant 0 : index
    %c29 = arith.constant 29 : index
    %c0_63 = arith.constant 0 : index
    %90 = vector.load %arg4[%c0_62, %c29, %c0_63] : memref<1x50x4xf32, #tpu.memory_space<vmem>>, vector<1x1x4xf32>
    %91 = vector.shape_cast %90 : vector<1x1x4xf32> to vector<1x4xf32>
    %92 = vector.shape_cast %2 : vector<1x4xf32> to vector<1x1x4xf32>
    tpu.vector_store %arg4[%c0_62, %c29, %c0_63], %92 {strides = array<i32>} : memref<1x50x4xf32, #tpu.memory_space<vmem>>, vector<1x1x4xf32>,
    %c0_64 = arith.constant 0 : index
    %c30 = arith.constant 30 : index
    %c0_65 = arith.constant 0 : index
    %93 = vector.load %arg4[%c0_64, %c30, %c0_65] : memref<1x50x4xf32, #tpu.memory_space<vmem>>, vector<1x1x4xf32>
    %94 = vector.shape_cast %93 : vector<1x1x4xf32> to vector<1x4xf32>
    %95 = vector.shape_cast %2 : vector<1x4xf32> to vector<1x1x4xf32>
    tpu.vector_store %arg4[%c0_64, %c30, %c0_65], %95 {strides = array<i32>} : memref<1x50x4xf32, #tpu.memory_space<vmem>>, vector<1x1x4xf32>,
    %c0_66 = arith.constant 0 : index
    %c31 = arith.constant 31 : index
    %c0_67 = arith.constant 0 : index
    %96 = vector.load %arg4[%c0_66, %c31, %c0_67] : memref<1x50x4xf32, #tpu.memory_space<vmem>>, vector<1x1x4xf32>
    %97 = vector.shape_cast %96 : vector<1x1x4xf32> to vector<1x4xf32>
    %98 = vector.shape_cast %2 : vector<1x4xf32> to vector<1x1x4xf32>
    tpu.vector_store %arg4[%c0_66, %c31, %c0_67], %98 {strides = array<i32>} : memref<1x50x4xf32, #tpu.memory_space<vmem>>, vector<1x1x4xf32>,
    %c0_68 = arith.constant 0 : index
    %c32 = arith.constant 32 : index
    %c0_69 = arith.constant 0 : index
    %99 = vector.load %arg4[%c0_68, %c32, %c0_69] : memref<1x50x4xf32, #tpu.memory_space<vmem>>, vector<1x1x4xf32>
    %100 = vector.shape_cast %99 : vector<1x1x4xf32> to vector<1x4xf32>
    %101 = vector.shape_cast %2 : vector<1x4xf32> to vector<1x1x4xf32>
    tpu.vector_store %arg4[%c0_68, %c32, %c0_69], %101 {strides = array<i32>} : memref<1x50x4xf32, #tpu.memory_space<vmem>>, vector<1x1x4xf32>,
    %c0_70 = arith.constant 0 : index
    %c33 = arith.constant 33 : index
    %c0_71 = arith.constant 0 : index
    %102 = vector.load %arg4[%c0_70, %c33, %c0_71] : memref<1x50x4xf32, #tpu.memory_space<vmem>>, vector<1x1x4xf32>
    %103 = vector.shape_cast %102 : vector<1x1x4xf32> to vector<1x4xf32>
    %104 = vector.shape_cast %2 : vector<1x4xf32> to vector<1x1x4xf32>
    tpu.vector_store %arg4[%c0_70, %c33, %c0_71], %104 {strides = array<i32>} : memref<1x50x4xf32, #tpu.memory_space<vmem>>, vector<1x1x4xf32>,
    %c0_72 = arith.constant 0 : index
    %c34 = arith.constant 34 : index
    %c0_73 = arith.constant 0 : index
    %105 = vector.load %arg4[%c0_72, %c34, %c0_73] : memref<1x50x4xf32, #tpu.memory_space<vmem>>, vector<1x1x4xf32>
    %106 = vector.shape_cast %105 : vector<1x1x4xf32> to vector<1x4xf32>
    %107 = vector.shape_cast %2 : vector<1x4xf32> to vector<1x1x4xf32>
    tpu.vector_store %arg4[%c0_72, %c34, %c0_73], %107 {strides = array<i32>} : memref<1x50x4xf32, #tpu.memory_space<vmem>>, vector<1x1x4xf32>,
    %c0_74 = arith.constant 0 : index
    %c35 = arith.constant 35 : index
    %c0_75 = arith.constant 0 : index
    %108 = vector.load %arg4[%c0_74, %c35, %c0_75] : memref<1x50x4xf32, #tpu.memory_space<vmem>>, vector<1x1x4xf32>
    %109 = vector.shape_cast %108 : vector<1x1x4xf32> to vector<1x4xf32>
    %110 = vector.shape_cast %2 : vector<1x4xf32> to vector<1x1x4xf32>
    tpu.vector_store %arg4[%c0_74, %c35, %c0_75], %110 {strides = array<i32>} : memref<1x50x4xf32, #tpu.memory_space<vmem>>, vector<1x1x4xf32>,
    %c0_76 = arith.constant 0 : index
    %c36 = arith.constant 36 : index
    %c0_77 = arith.constant 0 : index
    %111 = vector.load %arg4[%c0_76, %c36, %c0_77] : memref<1x50x4xf32, #tpu.memory_space<vmem>>, vector<1x1x4xf32>
    %112 = vector.shape_cast %111 : vector<1x1x4xf32> to vector<1x4xf32>
    %113 = vector.shape_cast %2 : vector<1x4xf32> to vector<1x1x4xf32>
    tpu.vector_store %arg4[%c0_76, %c36, %c0_77], %113 {strides = array<i32>} : memref<1x50x4xf32, #tpu.memory_space<vmem>>, vector<1x1x4xf32>,
    %c0_78 = arith.constant 0 : index
    %c37 = arith.constant 37 : index
    %c0_79 = arith.constant 0 : index
    %114 = vector.load %arg4[%c0_78, %c37, %c0_79] : memref<1x50x4xf32, #tpu.memory_space<vmem>>, vector<1x1x4xf32>
    %115 = vector.shape_cast %114 : vector<1x1x4xf32> to vector<1x4xf32>
    %116 = vector.shape_cast %2 : vector<1x4xf32> to vector<1x1x4xf32>
    tpu.vector_store %arg4[%c0_78, %c37, %c0_79], %116 {strides = array<i32>} : memref<1x50x4xf32, #tpu.memory_space<vmem>>, vector<1x1x4xf32>,
    %c0_80 = arith.constant 0 : index
    %c38 = arith.constant 38 : index
    %c0_81 = arith.constant 0 : index
    %117 = vector.load %arg4[%c0_80, %c38, %c0_81] : memref<1x50x4xf32, #tpu.memory_space<vmem>>, vector<1x1x4xf32>
    %118 = vector.shape_cast %117 : vector<1x1x4xf32> to vector<1x4xf32>
    %119 = vector.shape_cast %2 : vector<1x4xf32> to vector<1x1x4xf32>
    tpu.vector_store %arg4[%c0_80, %c38, %c0_81], %119 {strides = array<i32>} : memref<1x50x4xf32, #tpu.memory_space<vmem>>, vector<1x1x4xf32>,
    %c0_82 = arith.constant 0 : index
    %c39 = arith.constant 39 : index
    %c0_83 = arith.constant 0 : index
    %120 = vector.load %arg4[%c0_82, %c39, %c0_83] : memref<1x50x4xf32, #tpu.memory_space<vmem>>, vector<1x1x4xf32>
    %121 = vector.shape_cast %120 : vector<1x1x4xf32> to vector<1x4xf32>
    %122 = vector.shape_cast %2 : vector<1x4xf32> to vector<1x1x4xf32>
    tpu.vector_store %arg4[%c0_82, %c39, %c0_83], %122 {strides = array<i32>} : memref<1x50x4xf32, #tpu.memory_space<vmem>>, vector<1x1x4xf32>,
    %c0_84 = arith.constant 0 : index
    %c40 = arith.constant 40 : index
    %c0_85 = arith.constant 0 : index
    %123 = vector.load %arg4[%c0_84, %c40, %c0_85] : memref<1x50x4xf32, #tpu.memory_space<vmem>>, vector<1x1x4xf32>
    %124 = vector.shape_cast %123 : vector<1x1x4xf32> to vector<1x4xf32>
    %125 = vector.shape_cast %2 : vector<1x4xf32> to vector<1x1x4xf32>
    tpu.vector_store %arg4[%c0_84, %c40, %c0_85], %125 {strides = array<i32>} : memref<1x50x4xf32, #tpu.memory_space<vmem>>, vector<1x1x4xf32>,
    %c0_86 = arith.constant 0 : index
    %c41 = arith.constant 41 : index
    %c0_87 = arith.constant 0 : index
    %126 = vector.load %arg4[%c0_86, %c41, %c0_87] : memref<1x50x4xf32, #tpu.memory_space<vmem>>, vector<1x1x4xf32>
    %127 = vector.shape_cast %126 : vector<1x1x4xf32> to vector<1x4xf32>
    %128 = vector.shape_cast %2 : vector<1x4xf32> to vector<1x1x4xf32>
    tpu.vector_store %arg4[%c0_86, %c41, %c0_87], %128 {strides = array<i32>} : memref<1x50x4xf32, #tpu.memory_space<vmem>>, vector<1x1x4xf32>,
    %c0_88 = arith.constant 0 : index
    %c42 = arith.constant 42 : index
    %c0_89 = arith.constant 0 : index
    %129 = vector.load %arg4[%c0_88, %c42, %c0_89] : memref<1x50x4xf32, #tpu.memory_space<vmem>>, vector<1x1x4xf32>
    %130 = vector.shape_cast %129 : vector<1x1x4xf32> to vector<1x4xf32>
    %131 = vector.shape_cast %2 : vector<1x4xf32> to vector<1x1x4xf32>
    tpu.vector_store %arg4[%c0_88, %c42, %c0_89], %131 {strides = array<i32>} : memref<1x50x4xf32, #tpu.memory_space<vmem>>, vector<1x1x4xf32>,
    %c0_90 = arith.constant 0 : index
    %c43 = arith.constant 43 : index
    %c0_91 = arith.constant 0 : index
    %132 = vector.load %arg4[%c0_90, %c43, %c0_91] : memref<1x50x4xf32, #tpu.memory_space<vmem>>, vector<1x1x4xf32>
    %133 = vector.shape_cast %132 : vector<1x1x4xf32> to vector<1x4xf32>
    %134 = vector.shape_cast %2 : vector<1x4xf32> to vector<1x1x4xf32>
    tpu.vector_store %arg4[%c0_90, %c43, %c0_91], %134 {strides = array<i32>} : memref<1x50x4xf32, #tpu.memory_space<vmem>>, vector<1x1x4xf32>,
    %c0_92 = arith.constant 0 : index
    %c44 = arith.constant 44 : index
    %c0_93 = arith.constant 0 : index
    %135 = vector.load %arg4[%c0_92, %c44, %c0_93] : memref<1x50x4xf32, #tpu.memory_space<vmem>>, vector<1x1x4xf32>
    %136 = vector.shape_cast %135 : vector<1x1x4xf32> to vector<1x4xf32>
    %137 = vector.shape_cast %2 : vector<1x4xf32> to vector<1x1x4xf32>
    tpu.vector_store %arg4[%c0_92, %c44, %c0_93], %137 {strides = array<i32>} : memref<1x50x4xf32, #tpu.memory_space<vmem>>, vector<1x1x4xf32>,
    %c0_94 = arith.constant 0 : index
    %c45 = arith.constant 45 : index
    %c0_95 = arith.constant 0 : index
    %138 = vector.load %arg4[%c0_94, %c45, %c0_95] : memref<1x50x4xf32, #tpu.memory_space<vmem>>, vector<1x1x4xf32>
    %139 = vector.shape_cast %138 : vector<1x1x4xf32> to vector<1x4xf32>
    %140 = vector.shape_cast %2 : vector<1x4xf32> to vector<1x1x4xf32>
    tpu.vector_store %arg4[%c0_94, %c45, %c0_95], %140 {strides = array<i32>} : memref<1x50x4xf32, #tpu.memory_space<vmem>>, vector<1x1x4xf32>,
    %c0_96 = arith.constant 0 : index
    %c46 = arith.constant 46 : index
    %c0_97 = arith.constant 0 : index
    %141 = vector.load %arg4[%c0_96, %c46, %c0_97] : memref<1x50x4xf32, #tpu.memory_space<vmem>>, vector<1x1x4xf32>
    %142 = vector.shape_cast %141 : vector<1x1x4xf32> to vector<1x4xf32>
    %143 = vector.shape_cast %2 : vector<1x4xf32> to vector<1x1x4xf32>
    tpu.vector_store %arg4[%c0_96, %c46, %c0_97], %143 {strides = array<i32>} : memref<1x50x4xf32, #tpu.memory_space<vmem>>, vector<1x1x4xf32>,
    %c0_98 = arith.constant 0 : index
    %c47 = arith.constant 47 : index
    %c0_99 = arith.constant 0 : index
    %144 = vector.load %arg4[%c0_98, %c47, %c0_99] : memref<1x50x4xf32, #tpu.memory_space<vmem>>, vector<1x1x4xf32>
    %145 = vector.shape_cast %144 : vector<1x1x4xf32> to vector<1x4xf32>
    %146 = vector.shape_cast %2 : vector<1x4xf32> to vector<1x1x4xf32>
    tpu.vector_store %arg4[%c0_98, %c47, %c0_99], %146 {strides = array<i32>} : memref<1x50x4xf32, #tpu.memory_space<vmem>>, vector<1x1x4xf32>,
    %c0_100 = arith.constant 0 : index
    %c48 = arith.constant 48 : index
    %c0_101 = arith.constant 0 : index
    %147 = vector.load %arg4[%c0_100, %c48, %c0_101] : memref<1x50x4xf32, #tpu.memory_space<vmem>>, vector<1x1x4xf32>
    %148 = vector.shape_cast %147 : vector<1x1x4xf32> to vector<1x4xf32>
    %149 = vector.shape_cast %2 : vector<1x4xf32> to vector<1x1x4xf32>
    tpu.vector_store %arg4[%c0_100, %c48, %c0_101], %149 {strides = array<i32>} : memref<1x50x4xf32, #tpu.memory_space<vmem>>, vector<1x1x4xf32>,
    %c0_102 = arith.constant 0 : index
    %c49 = arith.constant 49 : index
    %c0_103 = arith.constant 0 : index
    %150 = vector.load %arg4[%c0_102, %c49, %c0_103] : memref<1x50x4xf32, #tpu.memory_space<vmem>>, vector<1x1x4xf32>
    %151 = vector.shape_cast %150 : vector<1x1x4xf32> to vector<1x4xf32>
    %152 = vector.shape_cast %2 : vector<1x4xf32> to vector<1x1x4xf32>
    tpu.vector_store %arg4[%c0_102, %c49, %c0_103], %152 {strides = array<i32>} : memref<1x50x4xf32, #tpu.memory_space<vmem>>, vector<1x1x4xf32>,
    return
  }
  func.func @transform_0(%arg0: i32, %arg1: i32) -> (i32, i32) {
    %c0_i32 = arith.constant 0 : i32
    %c0_i32_0 = arith.constant 0 : i32
    return %arg0, %c0_i32 : i32, i32
  }
  func.func @transform_1(%arg0: i32, %arg1: i32) -> (i32, i32) {
    %c0_i32 = arith.constant 0 : i32
    %c0_i32_0 = arith.constant 0 : i32
    return %c0_i32, %arg1 : i32, i32
  }
  func.func @transform_2(%arg0: i32, %arg1: i32) -> (i32, i32, i32) {
    %c0_i32 = arith.constant 0 : i32
    %c0_i32_0 = arith.constant 0 : i32
    return %arg0, %c0_i32, %arg1 : i32, i32, i32
  }
}

</mosaic_0001>

<bundles_post_ra>
// kernel: tpu_custom_call.1
= control target key start
LH: loop header
LB: loop body
LE: loop exit
PB: predicated region body
PF: predicated region fallthrough
CT: control target
= control target key end

     0   :  { %vm17_vm0 = vcmask 1044480   ;;  %vm13_vm1 = vcmask 39936   ;;  %v157_v0 = vmov 0.0   ;;  %vm158_vm2 = vmmov 0   ;;  %s380_s1 = inlined_call_operand.vmem [shape: f32[5,4], index: 1, kind: input, shape index: {}]   ;;  %s381_s0 = inlined_call_operand.vmem [shape: f32[1,5], index: 0, kind: input, shape index: {}]   ;;  %s382_s2 = inlined_call_operand.vmem [shape: f32[1,50,4], index: 2, kind: output, shape index: {}]  }
   0x1   :  { %150 = vmatprep.subr.mxu0 %v157_v0  ;;  %v12_v1 = vld [vmem:[%s380_s1] sm:$0x1f]  ;;  %152 = vmatprep.mubr.msk.f32.mxu0 %vm158_vm2, %v157_v0  ;;  %vm91_vm3 = vcmask 24576  }
   0x2   :  { %v11_v2 = vld [vmem:[%s381_s0] sm:$0x1]  ;;  %151 = vmatpush3.msk.msra.mxu0 %vm17_vm0, %v12_v1 }
   0x3   :  { %153 = vmatmul.mubr.msk.f32.vlgmr.msra.gmra.mrb[0].mxu0 %vm13_vm1, %v11_v2 }
  0xd6   :  { %v87_v3 = vpop.f32.mrb[0].mxu0 }
  0xd7   :  { %92 = vst.msk [vmem:[%s382_s2] sm:$0x1] %vm91_vm3, %v87_v3  ;;  %93 = vst.msk [vmem:[%s382_s2 + $0x1] sm:$0x1] %vm91_vm3, %v87_v3  ;;  %v154_v4 = vpop.f32.mrb[1].mxu0 }
  0xd8   :  { %94 = vst.msk [vmem:[%s382_s2 + $0x2] sm:$0x1] %vm91_vm3, %v87_v3  ;;  %95 = vst.msk [vmem:[%s382_s2 + $0x3] sm:$0x1] %vm91_vm3, %v87_v3 }
  0xd9   :  { %96 = vst.msk [vmem:[%s382_s2 + $0x4] sm:$0x1] %vm91_vm3, %v87_v3  ;;  %97 = vst.msk [vmem:[%s382_s2 + $0x5] sm:$0x1] %vm91_vm3, %v87_v3 }
  0xda   :  { %98 = vst.msk [vmem:[%s382_s2 + $0x6] sm:$0x1] %vm91_vm3, %v87_v3  ;;  %99 = vst.msk [vmem:[%s382_s2 + $0x7] sm:$0x1] %vm91_vm3, %v87_v3 }
  0xdb   :  { %100 = vst.msk [vmem:[%s382_s2 + $0x8] sm:$0x1] %vm91_vm3, %v87_v3  ;;  %101 = vst.msk [vmem:[%s382_s2 + $0x9] sm:$0x1] %vm91_vm3, %v87_v3 }
  0xdc   :  { %102 = vst.msk [vmem:[%s382_s2 + $0xa] sm:$0x1] %vm91_vm3, %v87_v3  ;;  %103 = vst.msk [vmem:[%s382_s2 + $0xb] sm:$0x1] %vm91_vm3, %v87_v3 }
  0xdd   :  { %104 = vst.msk [vmem:[%s382_s2 + $0xc] sm:$0x1] %vm91_vm3, %v87_v3  ;;  %105 = vst.msk [vmem:[%s382_s2 + $0xd] sm:$0x1] %vm91_vm3, %v87_v3 }
  0xde   :  { %106 = vst.msk [vmem:[%s382_s2 + $0xe] sm:$0x1] %vm91_vm3, %v87_v3  ;;  %107 = vst.msk [vmem:[%s382_s2 + $0xf] sm:$0x1] %vm91_vm3, %v87_v3 }
  0xdf   :  { %108 = vst.msk [vmem:[%s382_s2 + $0x10] sm:$0x1] %vm91_vm3, %v87_v3  ;;  %109 = vst.msk [vmem:[%s382_s2 + $0x11] sm:$0x1] %vm91_vm3, %v87_v3 }
  0xe0   :  { %110 = vst.msk [vmem:[%s382_s2 + $0x12] sm:$0x1] %vm91_vm3, %v87_v3  ;;  %111 = vst.msk [vmem:[%s382_s2 + $0x13] sm:$0x1] %vm91_vm3, %v87_v3 }
  0xe1   :  { %112 = vst.msk [vmem:[%s382_s2 + $0x14] sm:$0x1] %vm91_vm3, %v87_v3  ;;  %113 = vst.msk [vmem:[%s382_s2 + $0x15] sm:$0x1] %vm91_vm3, %v87_v3 }
  0xe2   :  { %114 = vst.msk [vmem:[%s382_s2 + $0x16] sm:$0x1] %vm91_vm3, %v87_v3  ;;  %115 = vst.msk [vmem:[%s382_s2 + $0x17] sm:$0x1] %vm91_vm3, %v87_v3 }
  0xe3   :  { %116 = vst.msk [vmem:[%s382_s2 + $0x18] sm:$0x1] %vm91_vm3, %v87_v3  ;;  %117 = vst.msk [vmem:[%s382_s2 + $0x19] sm:$0x1] %vm91_vm3, %v87_v3 }
  0xe4   :  { %118 = vst.msk [vmem:[%s382_s2 + $0x1a] sm:$0x1] %vm91_vm3, %v87_v3  ;;  %119 = vst.msk [vmem:[%s382_s2 + $0x1b] sm:$0x1] %vm91_vm3, %v87_v3 }
  0xe5   :  { %120 = vst.msk [vmem:[%s382_s2 + $0x1c] sm:$0x1] %vm91_vm3, %v87_v3  ;;  %121 = vst.msk [vmem:[%s382_s2 + $0x1d] sm:$0x1] %vm91_vm3, %v87_v3 }
  0xe6   :  { %122 = vst.msk [vmem:[%s382_s2 + $0x1e] sm:$0x1] %vm91_vm3, %v87_v3  ;;  %123 = vst.msk [vmem:[%s382_s2 + $0x1f] sm:$0x1] %vm91_vm3, %v87_v3 }
  0xe7   :  { %124 = vst.msk [vmem:[%s382_s2 + $0x20] sm:$0x1] %vm91_vm3, %v87_v3  ;;  %125 = vst.msk [vmem:[%s382_s2 + $0x21] sm:$0x1] %vm91_vm3, %v87_v3 }
  0xe8   :  { %126 = vst.msk [vmem:[%s382_s2 + $0x22] sm:$0x1] %vm91_vm3, %v87_v3  ;;  %127 = vst.msk [vmem:[%s382_s2 + $0x23] sm:$0x1] %vm91_vm3, %v87_v3 }
  0xe9   :  { %128 = vst.msk [vmem:[%s382_s2 + $0x24] sm:$0x1] %vm91_vm3, %v87_v3  ;;  %129 = vst.msk [vmem:[%s382_s2 + $0x25] sm:$0x1] %vm91_vm3, %v87_v3 }
  0xea   :  { %130 = vst.msk [vmem:[%s382_s2 + $0x26] sm:$0x1] %vm91_vm3, %v87_v3  ;;  %131 = vst.msk [vmem:[%s382_s2 + $0x27] sm:$0x1] %vm91_vm3, %v87_v3 }
  0xeb   :  { %132 = vst.msk [vmem:[%s382_s2 + $0x28] sm:$0x1] %vm91_vm3, %v87_v3  ;;  %133 = vst.msk [vmem:[%s382_s2 + $0x29] sm:$0x1] %vm91_vm3, %v87_v3 }
  0xec   :  { %134 = vst.msk [vmem:[%s382_s2 + $0x2a] sm:$0x1] %vm91_vm3, %v87_v3  ;;  %135 = vst.msk [vmem:[%s382_s2 + $0x2b] sm:$0x1] %vm91_vm3, %v87_v3 }
  0xed   :  { %136 = vst.msk [vmem:[%s382_s2 + $0x2c] sm:$0x1] %vm91_vm3, %v87_v3  ;;  %137 = vst.msk [vmem:[%s382_s2 + $0x2d] sm:$0x1] %vm91_vm3, %v87_v3 }
  0xee   :  { %138 = vst.msk [vmem:[%s382_s2 + $0x2e] sm:$0x1] %vm91_vm3, %v87_v3  ;;  %139 = vst.msk [vmem:[%s382_s2 + $0x2f] sm:$0x1] %vm91_vm3, %v87_v3 }
  0xef   :  { %140 = vst.msk [vmem:[%s382_s2 + $0x30] sm:$0x1] %vm91_vm3, %v87_v3  ;;  %141 = vst.msk [vmem:[%s382_s2 + $0x31] sm:$0x1] %vm91_vm3, %v87_v3 }

</bundles_post_ra>
